<compile_context>
chip_gen: v7x
topology: tpu7x:2x2x1
jax: 0.10.0
libtpu: 0.0.40
codegen_flags: <defaults>
</compile_context>

<pallas_src>
import jax
import jax.numpy as jnp
from jax.experimental import pallas as pl
from jax.experimental.pallas import tpu as pltpu

_BN_EPS = 0.001


def _round_up(x, m):
    return ((x + m - 1) // m) * m


def _vmem_limit_bytes():
    """Scoped-VMEM limit: generous on 128-MiB chips, safe (<=48 MiB) on 64-MiB v7x."""
    try:
        cap = int(pltpu.get_tpu_info().vmem_capacity_bytes)
    except Exception:
        cap = 64 * 1024 * 1024  # conservative fallback (v7x per-TC size)
    return int(max(32 << 20, min(cap - (16 << 20), 96 << 20)))


def _choose_hw_tile(hw_pad, cin, cout_p, x_bytes, out_bytes, budget_bytes):
    """Largest lane tile T (multiple of 128, dividing hw_pad) whose per-step footprint
    (double-buffered x/out slabs + f32 (Cout,T) in-kernel intermediates) fits."""
    per_t = (2 * cin * x_bytes          # double-buffered input slab
             + 2 * cout_p * out_bytes   # double-buffered output slab
             + 2 * cout_p * 4)          # f32 intermediates (y and y*y) in pass 1
    max_t = max(128, (budget_bytes // per_t) // 128 * 128)
    max_t = min(max_t, 8192, hw_pad)
    t = max_t
    while t > 128 and hw_pad % t != 0:
        t -= 128
    return t


def _stats_kernel(x_ref, w_ref, sum_ref, sumsq_ref):
    # x_ref:   (1, Cin, T)    input tile in its native dtype, lane dim = HW
    # w_ref:   (Cout_p, Cin)  1x1 conv weight cast to x dtype (resident block)
    # sum_ref, sumsq_ref: (1, Cout_p, 1) f32 per-N accumulators (resident over t axis)
    @pl.when(pl.program_id(1) == 0)
    def _():
        sum_ref[...] = jnp.zeros_like(sum_ref)
        sumsq_ref[...] = jnp.zeros_like(sumsq_ref)

    y = jnp.dot(w_ref[...], x_ref[0], preferred_element_type=jnp.float32)  # (Cout_p, T)
    sum_ref[...] += jnp.sum(y, axis=-1, keepdims=True)[None]
    sumsq_ref[...] += jnp.sum(y * y, axis=-1, keepdims=True)[None]


def _project_cm_kernel(x_ref, wf_ref, bias_ref, o_ref):
    # Channel-major output path (Cout < 128): o_ref is (1, Cout_p, T), lane dim = HW.
    y = jnp.dot(wf_ref[...], x_ref[0], preferred_element_type=jnp.float32)  # (Cout_p, T)
    y = jnp.maximum(y + bias_ref[...], 0.0)
    o_ref[0] = y.astype(o_ref.dtype)


def _project_tr_kernel(x_ref, wf_ref, bias_ref, o_ref):
    # Transposed output path (Cout >= 128): o_ref is (1, T, Cout_p), lane dim = Cout.
    # The XLU transpose is free here (XLU slot idle) and removes the XLA transpose pass.
    y = jnp.dot(wf_ref[...], x_ref[0], preferred_element_type=jnp.float32)  # (Cout_p, T)
    y = jnp.maximum(y + bias_ref[...], 0.0)
    o_ref[0] = y.T.astype(o_ref.dtype)


def conv_projection(x_nchw, conv_weight, bn_gamma, bn_beta):
    """Forward pass of ConvProjection.

    x_nchw:      (N, Cin, H, W)
    conv_weight: (Cout, Cin, 1, 1)   (PyTorch Conv2d weight layout, kernel_size=1)
    bn_gamma:    (Cout,)
    bn_beta:     (Cout,)
    returns:     (N, H*W, Cout)
    """
    N, Cin, H, W = x_nchw.shape
    Cout = conv_weight.shape[0]
    HW = H * W
    M = N * HW

    x_dtype = x_nchw.dtype
    x_bytes = jnp.dtype(x_dtype).itemsize

    # Free reshape (merges contiguous trailing dims); NO dtype cast of x.
    x = x_nchw.reshape(N, Cin, HW)

    # Pad HW to the lane multiple only (bounds waste to < 1 lane tile).
    HW_pad = _round_up(HW, 128)
    if HW_pad != HW:
        # Zero columns contribute nothing to sum / sum-of-squares (divide by true M)
        # and padded outputs are sliced off at the end.
        x = jnp.pad(x, ((0, 0), (0, 0), (0, HW_pad - HW)))

    # Pad Cout to the f32 sublane multiple for clean weight/bias/accumulator layouts.
    Cout_p = _round_up(Cout, 8)

    vmem_limit = _vmem_limit_bytes()
    T = _choose_hw_tile(HW_pad, Cin, Cout_p, x_bytes, x_bytes, (vmem_limit * 3) // 4)
    n_t = HW_pad // T

    w2d = conv_weight.reshape(Cout, Cin).astype(jnp.float32)
    w2d_p = jnp.pad(w2d, ((0, Cout_p - Cout), (0, 0)))           # (Cout_p, Cin) f32

    x_spec = pl.BlockSpec((1, Cin, T), lambda n, t: (n, 0, t))
    w_spec = pl.BlockSpec((Cout_p, Cin), lambda n, t: (0, 0))
    col_spec = pl.BlockSpec((Cout_p, 1), lambda n, t: (0, 0))
    nstat_spec = pl.BlockSpec((1, Cout_p, 1), lambda n, t: (n, 0, 0))

    # ---- Pass 1: per-(N, channel) partial sum / sum-of-squares of y = W x ----
    y_sum_n, y_sumsq_n = pl.pallas_call(
        _stats_kernel,
        out_shape=(
            jax.ShapeDtypeStruct((N, Cout_p, 1), jnp.float32),
            jax.ShapeDtypeStruct((N, Cout_p, 1), jnp.float32),
        ),
        grid=(N, n_t),
        in_specs=[x_spec, w_spec],
        out_specs=(nstat_spec, nstat_spec),
        compiler_params=pltpu.CompilerParams(
            dimension_semantics=("parallel", "arbitrary"),
            vmem_limit_bytes=vmem_limit,
        ),
    )(x, w2d_p.astype(x_dtype))

    # ---- Tiny O(Cout*Cin) BN algebra in f32: fold BN into conv weight / bias ----
    y_sum = jnp.sum(y_sum_n, axis=0)          # (Cout_p, 1)
    y_sumsq = jnp.sum(y_sumsq_n, axis=0)      # (Cout_p, 1)
    inv_m = 1.0 / float(M)
    mean = y_sum * inv_m
    var = jnp.maximum(y_sumsq * inv_m - mean * mean, 0.0)       # biased (train-mode) var
    inv_std = jax.lax.rsqrt(var + _BN_EPS)
    gamma_p = jnp.pad(bn_gamma.astype(jnp.float32).reshape(Cout, 1),
                      ((0, Cout_p - Cout), (0, 0)))
    beta_p = jnp.pad(bn_beta.astype(jnp.float32).reshape(Cout, 1),
                     ((0, Cout_p - Cout), (0, 0)))
    scale = gamma_p * inv_std
    bias = beta_p - mean * scale                                 # (Cout_p, 1), f32
    w_fold = (w2d_p * scale).astype(x_dtype)                     # (Cout_p, Cin), x dtype

    # ---- Pass 2: streaming y = W' x + b', ReLU, lane-dense stores ----
    fuse_transpose = Cout >= 128
    if fuse_transpose:
        out_shape = jax.ShapeDtypeStruct((N, HW_pad, Cout_p), x_dtype)
        out_spec = pl.BlockSpec((1, T, Cout_p), lambda n, t: (n, t, 0))
        kernel = _project_tr_kernel
    else:
        out_shape = jax.ShapeDtypeStruct((N, Cout_p, HW_pad), x_dtype)
        out_spec = pl.BlockSpec((1, Cout_p, T), lambda n, t: (n, 0, t))
        kernel = _project_cm_kernel

    out = pl.pallas_call(
        kernel,
        out_shape=out_shape,
        grid=(N, n_t),
        in_specs=[x_spec, w_spec, col_spec],
        out_specs=out_spec,
        compiler_params=pltpu.CompilerParams(
            dimension_semantics=("parallel", "parallel"),
            vmem_limit_bytes=vmem_limit,
        ),
    )(x, w_fold, bias)

    if fuse_transpose:
        if HW_pad != HW or Cout_p != Cout:
            out = out[:, :HW, :Cout]
        return out

    # Small Cout: (N, Cout_p, HW_pad) -> (N, HW, Cout); the transpose only moves
    # M*Cout elements (Cout < 128), cheaper than masked in-kernel stores.
    out = jnp.transpose(out, (0, 2, 1))
    return out[:, :HW, :Cout]


def _reference(x_nchw, conv_weight, bn_gamma, bn_beta):
    """Pure-JAX reference mirroring the PyTorch module (train-mode BN)."""
    N, Cin, H, W = x_nchw.shape
    Cout = conv_weight.shape[0]
    w = conv_weight.reshape(Cout, Cin).astype(jnp.float32)
    y = jnp.einsum("nchw,oc->nohw", x_nchw.astype(jnp.float32), w)   # 1x1 conv, no bias
    mean = jnp.mean(y, axis=(0, 2, 3), keepdims=True)
    var = jnp.mean((y - mean) ** 2, axis=(0, 2, 3), keepdims=True)
    y = (y - mean) / jnp.sqrt(var + _BN_EPS)
    y = y * bn_gamma.reshape(1, Cout, 1, 1) + bn_beta.reshape(1, Cout, 1, 1)
    y = jnp.maximum(y, 0.0)
    return jnp.transpose(y.reshape(N, Cout, H * W), (0, 2, 1)).astype(x_nchw.dtype)


if __name__ == "__main__":
    key = jax.random.PRNGKey(0)

    def run_case(N, Cin, Cout, H, W):
        kx, kw = jax.random.split(jax.random.fold_in(key, Cout))
        x = jax.random.normal(kx, (N, Cin, H, W), dtype=jnp.float32)
        # Conv2d(Cin, Cout, kernel_size=1, bias=False) weight; BatchNorm2d default init.
        conv_weight = 0.1 * jax.random.normal(kw, (Cout, Cin, 1, 1), dtype=jnp.float32)
        bn_gamma = jnp.ones((Cout,), dtype=jnp.float32)
        bn_beta = jnp.zeros((Cout,), dtype=jnp.float32)

        out = jax.block_until_ready(conv_projection(x, conv_weight, bn_gamma, bn_beta))
        ref = _reference(x, conv_weight, bn_gamma, bn_beta)
        assert out.shape == (N, H * W, Cout), out.shape
        assert jnp.allclose(out, ref, atol=1e-4, rtol=1e-4), "mismatch vs reference"

    # Small-Cout path: channel-major pass-2 output + tiny XLA transpose.
    run_case(N=2, Cin=8, Cout=4, H=16, W=16)
    # Wide-Cout path: output emitted pre-transposed from pass 2 (also exercises HW padding).
    run_case(N=2, Cin=16, Cout=128, H=12, W=12)

    print("KERNEL_OK")
</pallas_src>

<mosaic_0001>
module attributes {stable_mosaic.version = 11 : i64} {
  func.func @_stats_kernel(%arg0: i32, %arg1: i32, %arg2: memref<1x8x256xf32, #tpu.memory_space<vmem>>, %arg3: memref<8x8xf32, #tpu.memory_space<vmem>>, %arg4: memref<1x8x1xf32, #tpu.memory_space<vmem>>, %arg5: memref<1x8x1xf32, #tpu.memory_space<vmem>>) attributes {dimension_semantics = [#tpu.dimension_semantics<parallel>, #tpu.dimension_semantics<arbitrary>], iteration_bounds = array<i64: 2, 1>, scalar_prefetch = 0 : i64, scratch_operands = 0 : i64, tpu.core_type = #tpu.core_type<tc>, window_params = [{transform_indices = @transform_0, window_bounds = array<i64: 1, 8, 256>}, {pipeline_mode = #tpu.pipeline_mode<synchronous>, transform_indices = @transform_1, window_bounds = array<i64: 8, 8>}, {transform_indices = @transform_2, window_bounds = array<i64: 1, 8, 1>}, {transform_indices = @transform_3, window_bounds = array<i64: 1, 8, 1>}]} {
    %c0_i32 = arith.constant 0 : i32
    %0 = arith.cmpi eq, %arg1, %c0_i32 : i32
    %1 = arith.extui %0 : i1 to i32
    %c0_i32_0 = arith.constant 0 : i32
    %2 = arith.cmpi ne, %1, %c0_i32_0 : i32
    scf.if %2 {
      %cst_19 = arith.constant 0.000000e+00 : f32
      %20 = vector.broadcast %cst_19 : f32 to vector<1x8x1xf32>
      %c0_20 = arith.constant 0 : index
      %c0_21 = arith.constant 0 : index
      %c0_22 = arith.constant 0 : index
      %21 = vector.load %arg4[%c0_20, %c0_21, %c0_22] : memref<1x8x1xf32, #tpu.memory_space<vmem>>, vector<1x8x1xf32>
      tpu.vector_store %arg4[%c0_20, %c0_21, %c0_22], %20 {strides = array<i32>} : memref<1x8x1xf32, #tpu.memory_space<vmem>>, vector<1x8x1xf32>,
      %cst_23 = arith.constant 0.000000e+00 : f32
      %22 = vector.broadcast %cst_23 : f32 to vector<1x8x1xf32>
      %c0_24 = arith.constant 0 : index
      %c0_25 = arith.constant 0 : index
      %c0_26 = arith.constant 0 : index
      %23 = vector.load %arg5[%c0_24, %c0_25, %c0_26] : memref<1x8x1xf32, #tpu.memory_space<vmem>>, vector<1x8x1xf32>
      tpu.vector_store %arg5[%c0_24, %c0_25, %c0_26], %22 {strides = array<i32>} : memref<1x8x1xf32, #tpu.memory_space<vmem>>, vector<1x8x1xf32>,
    } else {
    }
    %c0 = arith.constant 0 : index
    %c0_1 = arith.constant 0 : index
    %3 = vector.load %arg3[%c0, %c0_1] : memref<8x8xf32, #tpu.memory_space<vmem>>, vector<8x8xf32>
    %c0_2 = arith.constant 0 : index
    %c0_3 = arith.constant 0 : index
    %c0_4 = arith.constant 0 : index
    %4 = vector.load %arg2[%c0_2, %c0_3, %c0_4] : memref<1x8x256xf32, #tpu.memory_space<vmem>>, vector<1x8x256xf32>
    %5 = vector.shape_cast %4 : vector<1x8x256xf32> to vector<8x256xf32>
    %cst = arith.constant dense<0.000000e+00> : vector<8x256xf32>
    %6 = tpu.matmul %3, %5, %cst {dimension_numbers = #tpu.dot_dimension_numbers<[1], [0], [0], [1], [0, 0, 1, 1], [], []>} : vector<8x8xf32>, vector<8x256xf32>, vector<8x256xf32> -> vector<8x256xf32>
    %c0_5 = arith.constant 0 : index
    %c0_6 = arith.constant 0 : index
    %c0_7 = arith.constant 0 : index
    %7 = vector.load %arg4[%c0_5, %c0_6, %c0_7] : memref<1x8x1xf32, #tpu.memory_space<vmem>>, vector<1x8x1xf32>
    %cst_8 = arith.constant dense<0.000000e+00> : vector<8xf32>
    %8 = vector.multi_reduction <add>, %6, %cst_8 [1] : vector<8x256xf32> to vector<8xf32>
    %9 = vector.shape_cast %8 : vector<8xf32> to vector<8x1xf32>
    %10 = vector.shape_cast %9 : vector<8x1xf32> to vector<1x8x1xf32>
    %11 = arith.addf %7, %10 : vector<1x8x1xf32>
    %c0_9 = arith.constant 0 : index
    %c0_10 = arith.constant 0 : index
    %c0_11 = arith.constant 0 : index
    %12 = vector.load %arg4[%c0_9, %c0_10, %c0_11] : memref<1x8x1xf32, #tpu.memory_space<vmem>>, vector<1x8x1xf32>
    tpu.vector_store %arg4[%c0_9, %c0_10, %c0_11], %11 {strides = array<i32>} : memref<1x8x1xf32, #tpu.memory_space<vmem>>, vector<1x8x1xf32>,
    %c0_12 = arith.constant 0 : index
    %c0_13 = arith.constant 0 : index
    %c0_14 = arith.constant 0 : index
    %13 = vector.load %arg5[%c0_12, %c0_13, %c0_14] : memref<1x8x1xf32, #tpu.memory_space<vmem>>, vector<1x8x1xf32>
    %14 = arith.mulf %6, %6 : vector<8x256xf32>
    %cst_15 = arith.constant dense<0.000000e+00> : vector<8xf32>
    %15 = vector.multi_reduction <add>, %14, %cst_15 [1] : vector<8x256xf32> to vector<8xf32>
    %16 = vector.shape_cast %15 : vector<8xf32> to vector<8x1xf32>
    %17 = vector.shape_cast %16 : vector<8x1xf32> to vector<1x8x1xf32>
    %18 = arith.addf %13, %17 : vector<1x8x1xf32>
    %c0_16 = arith.constant 0 : index
    %c0_17 = arith.constant 0 : index
    %c0_18 = arith.constant 0 : index
    %19 = vector.load %arg5[%c0_16, %c0_17, %c0_18] : memref<1x8x1xf32, #tpu.memory_space<vmem>>, vector<1x8x1xf32>
    tpu.vector_store %arg5[%c0_16, %c0_17, %c0_18], %18 {strides = array<i32>} : memref<1x8x1xf32, #tpu.memory_space<vmem>>, vector<1x8x1xf32>,
    return
  }
  func.func @transform_0(%arg0: i32, %arg1: i32) -> (i32, i32, i32) {
    %c0_i32 = arith.constant 0 : i32
    %c0_i32_0 = arith.constant 0 : i32
    return %arg0, %c0_i32, %arg1 : i32, i32, i32
  }
  func.func @transform_1(%arg0: i32, %arg1: i32) -> (i32, i32) {
    %c0_i32 = arith.constant 0 : i32
    %c0_i32_0 = arith.constant 0 : i32
    %c0_i32_1 = arith.constant 0 : i32
    return %c0_i32, %c0_i32_0 : i32, i32
  }
  func.func @transform_2(%arg0: i32, %arg1: i32) -> (i32, i32, i32) {
    %c0_i32 = arith.constant 0 : i32
    %c0_i32_0 = arith.constant 0 : i32
    %c0_i32_1 = arith.constant 0 : i32
    return %arg0, %c0_i32, %c0_i32_0 : i32, i32, i32
  }
  func.func @transform_3(%arg0: i32, %arg1: i32) -> (i32, i32, i32) {
    %c0_i32 = arith.constant 0 : i32
    %c0_i32_0 = arith.constant 0 : i32
    %c0_i32_1 = arith.constant 0 : i32
    return %arg0, %c0_i32, %c0_i32_0 : i32, i32, i32
  }
}

</mosaic_0001>

<bundles_post_ra>
// kernel: tpu_custom_call.1
= control target key start
LH: loop header
LB: loop body
LE: loop exit
PB: predicated region body
PF: predicated region fallthrough
CT: control target
= control target key end

     0   :  { %9 = vsyncpa [#allocation3], 0  ;;  %s836_s0 = inlined_call_operand.hbm [shape: f32[2,8,256], index: 0, kind: input, shape index: {}]   ;;  %s837_s1 = inlined_call_operand.hbm [shape: f32[8,8], index: 1, kind: input, shape index: {}]   ;;  %s838_s2 = inlined_call_operand.vmem [shape: f32[2,8,1], index: 2, kind: output, shape index: {0}]   ;;  %s839_s3 = inlined_call_operand.vmem [shape: f32[2,8,1], index: 3, kind: output, shape index: {1}]  }
   0x1   :  { %11 = vsyncpa [#allocation3 + $0x1], 0 }
   0x2   :  { %12 = vsyncpa [#allocation5], 0  ;;  %s666_s12 = smov 0   ;;  %s668_s13 = smov 0  }
   0x3   :  { %s670_s14 = smov 0   ;;  %s672_s15 = smov 0  }
   0x4   :  { %s674_s16 = smov 0   ;;  %s676_s17 = smov 0  }
   0x5 LB: > { %s445_s18 = sadd.s32 4294967295, %s641_s17   ;;  %p52_p0 = scmp.ne.s32.totalorder %s625_s13, %s621_s12  ;;  %s641_s17 = sphi %s676_s17, %s18_s17   ;;  %s637_s16 = sphi %s674_s16, %s858_s16   ;;  %s633_s15 = sphi %s672_s15, %s857_s15   ;;  %s629_s14 = sphi %s670_s14, %s856_s14   ;;  %s625_s13 = sphi %s668_s13, %s855_s13   ;;  %s621_s12 = sphi %s666_s12, %s854_s12  }
   0x6   : > { %p696_p1 = scmp.eq.s32.totalorder %s445_s18, 0  ;;  %p447_p2 = scmp.ge.s32.totalorder %s641_s17, 1 }
   0x7   : > { %p136_p3 = scmp.lt.s32.totalorder %s641_s17, 3  ;;  %s643_s22 = smov [#allocation4]  }
   0x8   : > { %s844_s19 = scalar_select %p696_p1, 1, 0 }
   0x9   : > { %p704_p4 = por %p696_p1, %p52_p0  ;;  %p708_p5 = pnand %p447_p2, %p136_p3 }
   0xa   : > { %s149_s23 = sshll.u32 %s643_s22, 4  ;;  %s30_s25 = sadd.s32 1, %s637_s16  ;;  %s150_s23 = int_to_ptr.vmem [resolvable:$true] %s149_s23 }
   0xb   : > { %s845_s20 = scalar_select %p704_p4, 1, 0 }
   0xc   : > { %s846_s21 = scalar_select %p708_p5, 1, 0 }
   0xd   : > { %p468_p6 = pneg %p708_p5  ;;  %s39_s26 = sadd.s32 1, %s629_s14 }
   0xe   : > { %p722_p8 = scmp.ge.s32.totalorder %s30_s25, 2  ;;  %s529_s30 = scalar_lea.hbm %s837_s1, 128 }
   0xf   : > { %p716_p7 = pnand %p468_p6, %p696_p1  ;;  %p530_p9 = scmp.ne.s32.totalorder %s837_s1, %s529_s30 }
  0x10   : > { %s848_s27 = scalar_select %p722_p8, 1, 0 }
  0x11   : > { %p531_p10 = pneg %p716_p7  ;;  %p536_p13 = scmp.lt.u32.totalorder %s529_s30, %s837_s1 }
  0x13   : > { %p532_p11 = pnand %p531_p10, %p530_p9 }
  0x15   : > { %p533_p12 = pneg %p532_p11 }
  0x17   : > { %p538_p0 = pnand %p536_p13, %p533_p12 }
  0x19   : > { %541 = shalt.err (!%p538_p0)
}
  0x1a   : > { %s542_s8 = scalar_lea.vmem %s150_s23, 128  ;;  %p550_p1 = scmp.lt.s32.totalorder %s150_s23, %s150_s23 }
  0x1b   : > { %p543_p2 = scmp.ne.s32.totalorder %s150_s23, %s542_s8  ;;  %p551_p4 = scmp.lt.s32.totalorder %s542_s8, %s542_s8 }
  0x1d   : > { %p545_p3 = pnand %p543_p2, %p531_p10  ;;  %p552_p5 = por %p551_p4, %p550_p1 }
  0x1f   : > { %p546_p6 = pneg %p545_p3 }
  0x21   : > { %p553_p8 = pnand %p552_p5, %p546_p6 }
  0x23   : > { %556 = shalt.err (!%p553_p8)
}
  0x24   : > { %471 = dma.hbm_to_vmem [thread:$0]  (!%p716_p7), %s837_s1, 128, %s150_s23, [#allocation5]  }
  0x25   : > { %p849_p9 = scmp.ne.s32.totalorder %s848_s27, 0  ;;  %p46_p1 = scmp.ne.s32.totalorder %s629_s14, %s625_s13 }
  0x26   : > { %p47_p4 = scmp.eq.s32.totalorder %s641_s17, 0  ;;  %p477_p5 = scmp.lt.s32.totalorder %s641_s17, 2 }
  0x27   : > { %s860_s25 = smov (%p849_p9, %s30_s25), 0  ;;  %s160_s12 = sand.u32 1, %s629_s14  }
  0x28   : > { %s34_s11 = ssub.s32 %s637_s16, %s860_s25  ;;  %p48_p10 = por %p47_p4, %p46_p1 }
  0x29   : > { %p37_p8 = scmp.eq.s32.totalorder %s34_s11, 0  ;;  %s461_s18 = sshll.u32 %s637_s16, 8 }
  0x2a   : > { %s450_s24 = sshll.u32 %s160_s12, 4  ;;  %s762_s23 = scalar_lea.hbm %s836_s0, %s461_s18 }
  0x2b   : > { %s757_s22 = scalar_select %p37_p8, %s629_s14, %s39_s26  }
  0x2c   : > { %s164_s27 = scalar_lea.vmem [#allocation2], %s450_s24  ;;  %p764_p7 = pnand %p477_p5, %p48_p10 }
  0x2d   : > { %s174_s30 = sshll.u32 %s164_s27, 4  ;;  %s161_s26 = scalar_lea.sflag [#allocation3], %s160_s12  ;;  %s768_s30 = int_to_ptr.vmem [resolvable:$true] %s174_s30 }
  0x2e   : > { %s557_s5 = scalar_lea.hbm %s762_s23, 256  ;;  %p559_p12 = pneg %p764_p7 }
  0x2f   : > { %p558_p11 = scmp.ne.s32.totalorder %s762_s23, %s557_s5  ;;  %s562_s8 = scalar_lea.hbm %s836_s0, 512 }
  0x30   : > { %p563_p2 = scmp.lt.u32.totalorder %s762_s23, %s836_s0  ;;  %p564_p3 = scmp.lt.u32.totalorder %s562_s8, %s557_s5 }
  0x31   : > { %p560_p13 = pnand %p559_p12, %p558_p11  ;;  %p566_p9 = scmp.lt.u32.totalorder %s557_s5, %s762_s23 }
  0x32   : > { %p565_p6 = por %p564_p3, %p563_p2 }
  0x33   : > { %p561_p0 = pneg %p560_p13 }
  0x34   : > { %p567_p1 = por %p566_p9, %p565_p6 }
  0x36   : > { %p568_p4 = pnand %p567_p1, %p561_p0 }
  0x38   : > { %571 = shalt.err (!%p568_p4)
}
  0x39   : > { %s572_s11 = scalar_lea.vmem %s768_s30, 256  ;;  %s644_s12 = smov [#allocation2]  }
  0x3a   : > { %p573_p5 = scmp.ne.s32.totalorder %s768_s30, %s572_s11  ;;  %s577_s18 = sshll.u32 %s644_s12, 4  ;;  %s578_s18 = int_to_ptr.vmem [resolvable:$false] %s577_s18 }
  0x3b   : > { %s579_s24 = scalar_lea.vmem %s578_s18, 512  ;;  %p580_p11 = scmp.lt.s32.totalorder %s768_s30, %s578_s18 }
  0x3c   : > { %p575_p8 = pnand %p573_p5, %p559_p12  ;;  %p581_p13 = scmp.lt.s32.totalorder %s579_s24, %s572_s11 }
  0x3e   : > { %p576_p10 = pneg %p575_p8  ;;  %p582_p2 = por %p581_p13, %p580_p11 }
  0x40   : > { %p583_p3 = pnand %p582_p2, %p576_p10 }
  0x42   : > { %586 = shalt.err (!%p583_p3)
}
  0x43   : > { %475 = dma.hbm_to_vmem [thread:$0]  (!%p764_p7), %s762_s23, 256, %s768_s30, %s161_s26  }
  0x44   : > { %p851_p0 = scmp.ne.s32.totalorder %s846_s21, 0 }
  0x45   : > { %s185_s28 = sand.u32 (!%p851_p0), 1, %s625_s13   ;;  %p852_p12 = scmp.ne.s32.totalorder (!%p851_p0), %s845_s20, 0 }
  0x46   : > { %183 = sbr.rel (%p851_p0) target bundleno = 448 (0x1c0), region = 28  ;;  %s454_s29 = sshll.u32 (!%p851_p0), %s185_s28, 4 }
  0x47   : > { %s186_s27 = scalar_lea.sflag (!%p851_p0), [#allocation3], %s185_s28  ;;  %s189_s5 = scalar_lea.vmem (!%p851_p0), [#allocation2], %s454_s29 }
  0x4d   : > { %612 = dma.done.wait (%p852_p12), %s186_s27, 256  }
  0x4e   : > { %614 = vsyncadd (%p852_p12), %s186_s27, 4294967040  ;;  %p853_p6 = scmp.ne.s32.totalorder %s844_s19, 0 }
  0x50   : > { %616 = dma.done.wait (%p853_p6), [#allocation5], 128  }
  0x51   : > { %618 = vsyncadd (%p853_p6), [#allocation5], 4294967168  ;;  %v645_v0 = vmov 0.0   ;;  %v237_v1 = vld [vmem:[%s189_s5 + $0x8] sm:$0xff]  ;;  %v236_v2 = vld [vmem:[%s189_s5] sm:$0xff]  ;;  %vm238_vm0 = vcmask 64512  }
  0x52   : > { %306 = vmatprep.mubr.f32.mxu0 %v645_v0  ;;  %v235_v3 = vld [vmem:[#allocation4] sm:$0xff]  ;;  %242 = vmatprep.subr.mxu0 %v237_v1  ;;  %p220_p7 = scmp.lt.s32.totalorder %s633_s15, 1  ;;  %vm232_vm1 = vcmask 7168  }
  0x53   : > { %243 = vmatpush1.msra.mxu0 %v236_v2 }
  0x54   : > { %458 = vmatmul.mubr.msk.f32.vlgmr.msra.gmra.mrb[0].mxu0 %vm238_vm0, %v235_v3  ;;  %s862_s15 = smov (!%p220_p7, %s633_s15), 1 }
  0x55   : > { %s456_s20 = sshll.u32 %s862_s15, 3 }
  0x56   : > { %s223_s19 = scalar_lea.vmem %s838_s2, %s456_s20  ;;  %s227_s26 = scalar_lea.vmem %s839_s3, %s456_s20 }
  0x57   : > { %233 = vst.msk [vmem:[%s223_s19] sm:$0xff] %vm232_vm1, %v645_v0  ;;  %234 = vst.msk [vmem:[%s227_s26] sm:$0xff] %vm232_vm1, %v645_v0 }
  0x5e   : > { %v313_v10 = vld [vmem:[%s223_s19] sm:$0xff] }
  0x5f   : > { %v320_v13 = vld [vmem:[%s227_s26] sm:$0xff] }
 0x127   : > { %v308_v4 = vpop.f32.mrb[0].mxu0 }
 0x128   : > { %v321_v5 = vmul.f32 %v308_v4, %v308_v4  ;;  %v310_v6 = vpop.f32.mrb[1].mxu0 }
 0x129   : > { %v322_v7 = vmul.f32 %v310_v6, %v310_v6  ;;  %v314_v8 = vadd.f32 %v310_v6, %v308_v4 }
 0x12b   : > { %315 = vadd.xlane.f32.xlu0 %v314_v8  ;;  %v323_v9 = vadd.f32 %v322_v7, %v321_v5 }
 0x12f   : > { %324 = vadd.xlane.f32.xlu0 %v323_v9 }
 0x1b8   : > { %v316_v11 = vpop.xlane.xlu0 %315 }
 0x1b9   : > { %v317_v12 = vadd.f32 %v316_v11, %v313_v10 }
 0x1bb   : > { %319 = vst.msk [vmem:[%s223_s19] sm:$0xff] %vm232_vm1, %v317_v12 }
 0x1bc   : > { %v325_v14 = vpop.xlane.xlu0 %324 }
 0x1bd   : > { %v326_v15 = vadd.f32 %v325_v14, %v320_v13 }
 0x1bf   : > { %327 = vst.msk [vmem:[%s227_s26] sm:$0xff] %vm232_vm1, %v326_v15 }
 0x1c0 PF: > { %s18_s17 = sadd.s32 1, %s641_s17   ;;  %s854_s12 = smov %s625_s13 }
 0x1c1   : > { %p15_p9 = scmp.ge.s32.totalorder %s18_s17, 4   ;;  %s855_s13 = smov %s629_s14 }
 0x1c2   : > { %s856_s14 = smov %s757_s22  ;;  %s857_s15 = smov %s637_s16 }
 0x1c3   : > { %s858_s16 = smov %s860_s25  ;;  %17 = sbr.rel (!%p15_p9) target bundleno = 5 (0x5), region = 88 }
 0x1ca   :  { %361 = vsyncpa [#allocation3], 1 }
 0x1cb   :  { %363 = vsyncpa [#allocation3 + $0x1], 1 }
 0x1cc   :  { %364 = vsyncpa [#allocation5], 1 }

</bundles_post_ra>
